<compile_context>
chip_gen: v6e
topology: v6e:2x2x1
jax: 0.10.0
libtpu: 0.0.40
codegen_flags: <defaults>
</compile_context>

<pallas_src>
import functools

import jax
import jax.numpy as jnp
import numpy as np
from jax.experimental import pallas as pl
from jax.experimental.pallas import tpu as pltpu

K = 3
STRIDE = 2
PAD = 1
OUT_PAD = 1

# (output phase parity d, input shift e) -> kernel tap k, for k=3 / s=2 / p=1:
#   k = d - 2*e + pad ;  (d=0, e=1) has no valid tap (contributes zero).
_TAP = {(0, 0): 1, (1, 0): 2, (1, 1): 0}


def _decoder_kernel(x_ref, w_ref, b_ref, o_ref):
    # x_ref: (1, 4*Cin, TH*W)   shifted-input stack, channel-major, lanes = TH*W
    # w_ref: (4*Cout, 4*Cin)    packed phase weights (transposed)
    # b_ref: (4*Cout, 1)        bias per packed output channel
    # o_ref: (1, 4*Cout, TH*W)  packed phase outputs, lanes = TH*W
    y = jax.lax.dot_general(
        w_ref[...], x_ref[0],
        dimension_numbers=(((1,), (0,)), ((), ())),
        preferred_element_type=jnp.float32)
    o_ref[0] = (y + b_ref[...]).astype(o_ref.dtype)


def _pack_weight(weight):
    """ConvTranspose2d weight (Cin, Cout, 3, 3) -> packed (4*Cout, 4*Cin)."""
    Cin, Cout = weight.shape[0], weight.shape[1]
    w_all = jnp.zeros((4 * Cin, 4 * Cout), weight.dtype)
    for dy in (0, 1):
        for dx in (0, 1):
            p = 2 * dy + dx                      # output phase
            for ey in (0, 1):
                for ex in (0, 1):
                    if (dy, ey) not in _TAP or (dx, ex) not in _TAP:
                        continue                 # tap falls outside the 3x3 kernel
                    ky, kx = _TAP[(dy, ey)], _TAP[(dx, ex)]
                    s = 2 * ey + ex              # input shift slot
                    w_all = w_all.at[s * Cin:(s + 1) * Cin,
                                     p * Cout:(p + 1) * Cout].set(weight[:, :, ky, kx])
    return w_all.T                               # (4*Cout, 4*Cin)


def _pick_row_tile(H, W, Cin, Cout):
    # Largest divisor TH of H whose flattened lane extent TH*W is a multiple of
    # 128 (lane-dense, unmasked stores) and whose f32 in+out blocks stay under
    # ~2 MiB (comfortably double-buffered under default scoped VMEM on
    # v5e/v6e/v7x).  Falls back to full-extent blocks when W is awkward.
    budget = 2 << 20
    best = None
    for th in range(1, H + 1):
        if H % th or (th * W) % 128:
            continue
        if 4 * (Cin + Cout) * th * W * 4 <= budget:
            best = th
    return best if best is not None else H


@functools.partial(jax.jit, static_argnames=("row_tile",))
def decoder_forward(x_nchw, weight, bias, row_tile=None):
    """ConvTranspose2d(Cin, Cout, 3, stride=2, padding=1, output_padding=1).

    x_nchw: (N, Cin, H, W); weight: (Cin, Cout, 3, 3); bias: (Cout,).
    Returns (N, Cout, 2H, 2W) — identical semantics to the PyTorch Decoder.
    """
    N, Cin, H, W = x_nchw.shape
    Cout = weight.shape[1]
    Ho, Wo = 2 * H, 2 * W

    TH = _pick_row_tile(H, W, Cin, Cout) if row_tile is None else row_tile
    assert H % TH == 0 and (TH == H or (TH * W) % 128 == 0), (TH, H, W)

    # ---- glue (plain JAX): 4-way shifted input stack, channel-major ----------
    x = jnp.transpose(x_nchw, (0, 2, 3, 1))                  # (N, H, W, Cin)
    xp = jnp.pad(x, ((0, 0), (0, 1), (0, 1), (0, 0)))        # zero halo bottom/right
    slots = [xp[:, ey:ey + H, ex:ex + W, :] for ey in (0, 1) for ex in (0, 1)]
    xstack = jnp.stack(slots, axis=3)                        # (N, H, W, 4, Cin)
    x_cm = jnp.transpose(xstack, (0, 3, 4, 1, 2)).reshape(N, 4 * Cin, H * W)

    w_t = _pack_weight(weight)                               # (4*Cout, 4*Cin)
    b_t = jnp.tile(bias, 4).reshape(4 * Cout, 1)             # (4*Cout, 1)
    # NOTE: on v6e/v7x, casting x_cm / w_t to bf16 (keeping f32 accumulation)
    # halves operand bytes; kept f32 here to match the f32 reference tolerance.

    flops = 2 * N * H * W * (4 * Cin) * (4 * Cout)
    bytes_accessed = 4 * (x_cm.size + w_t.size + b_t.size + N * 4 * Cout * H * W)

    out_packed = pl.pallas_call(
        _decoder_kernel,
        out_shape=jax.ShapeDtypeStruct((N, 4 * Cout, H * W), x.dtype),
        grid_spec=pltpu.PrefetchScalarGridSpec(
            num_scalar_prefetch=0,
            grid=(N, H // TH),
            in_specs=[
                pl.BlockSpec((1, 4 * Cin, TH * W), lambda n, h: (n, 0, h)),
                pl.BlockSpec((4 * Cout, 4 * Cin), lambda n, h: (0, 0)),
                pl.BlockSpec((4 * Cout, 1), lambda n, h: (0, 0)),
            ],
            out_specs=pl.BlockSpec((1, 4 * Cout, TH * W), lambda n, h: (n, 0, h)),
        ),
        compiler_params=pltpu.CompilerParams(
            dimension_semantics=("parallel", "parallel"),
            vmem_limit_bytes=32 * 1024 * 1024),
        cost_estimate=pl.CostEstimate(
            flops=flops, transcendentals=0, bytes_accessed=bytes_accessed),
    )(x_cm, w_t, b_t)

    # ---- un-pack phases (depth_to_space) back to NCHW -------------------------
    y = out_packed.reshape(N, 2, 2, Cout, H, W)              # (N, dy, dx, C, py, px)
    y = jnp.transpose(y, (0, 3, 4, 1, 5, 2))                 # (N, C, py, dy, px, dx)
    return y.reshape(N, Cout, Ho, Wo)


def _ref_conv_transpose(x_nchw, weight, bias):
    # Independent reference path via XLA's dilated convolution.
    w_oihw = jnp.transpose(jnp.flip(weight, (2, 3)), (1, 0, 2, 3))  # (Cout,Cin,K,K)
    y = jax.lax.conv_general_dilated(
        x_nchw, w_oihw,
        window_strides=(1, 1),
        padding=[(K - 1 - PAD, K - 1 - PAD + OUT_PAD)] * 2,
        lhs_dilation=(STRIDE, STRIDE),
        dimension_numbers=('NCHW', 'OIHW', 'NCHW'))
    return y + bias[None, :, None, None]


if __name__ == "__main__":
    key = jax.random.PRNGKey(0)
    k1, k2, k3 = jax.random.split(key, 3)

    N, Cin, Cout, H, W = 2, 4, 8, 16, 16
    x = jax.random.normal(k1, (N, Cin, H, W), dtype=jnp.float32)
    # ConvTranspose2d weight layout: (Cin, Cout, K, K)
    weight = jax.random.normal(k2, (Cin, Cout, K, K), dtype=jnp.float32) * 0.1
    bias = jax.random.normal(k3, (Cout,), dtype=jnp.float32) * 0.1

    ref = jax.block_until_ready(_ref_conv_transpose(x, weight, bias))

    # Default tile (largest lane-dense block within the VMEM budget) and an
    # explicit smaller tile that exercises the multi-step spatial grid axis.
    for rt in (None, 8):
        out = jax.block_until_ready(decoder_forward(x, weight, bias, row_tile=rt))
        assert out.shape == (N, Cout, 2 * H, 2 * W), out.shape
        np.testing.assert_allclose(np.asarray(out), np.asarray(ref),
                                   rtol=1e-4, atol=1e-4)
    print("KERNEL_OK")
</pallas_src>

<mosaic_0001>
module attributes {stable_mosaic.version = 11 : i64} {
  func.func @_decoder_kernel(%arg0: i32, %arg1: i32, %arg2: memref<1x16x256xf32, #tpu.memory_space<vmem>>, %arg3: memref<32x16xf32, #tpu.memory_space<vmem>>, %arg4: memref<32x1xf32, #tpu.memory_space<vmem>>, %arg5: memref<1x32x256xf32, #tpu.memory_space<vmem>>) attributes {dimension_semantics = [#tpu.dimension_semantics<parallel>, #tpu.dimension_semantics<parallel>], iteration_bounds = array<i64: 2, 1>, scalar_prefetch = 0 : i64, scratch_operands = 0 : i64, tpu.core_type = #tpu.core_type<tc>, window_params = [{transform_indices = @transform_0, window_bounds = array<i64: 1, 16, 256>}, {pipeline_mode = #tpu.pipeline_mode<synchronous>, transform_indices = @transform_1, window_bounds = array<i64: 32, 16>}, {pipeline_mode = #tpu.pipeline_mode<synchronous>, transform_indices = @transform_2, window_bounds = array<i64: 32, 1>}, {transform_indices = @transform_3, window_bounds = array<i64: 1, 32, 256>}]} {
    %c0 = arith.constant 0 : index
    %c0_0 = arith.constant 0 : index
    %0 = vector.load %arg3[%c0, %c0_0] : memref<32x16xf32, #tpu.memory_space<vmem>>, vector<32x16xf32>
    %c0_1 = arith.constant 0 : index
    %c0_2 = arith.constant 0 : index
    %c0_3 = arith.constant 0 : index
    %1 = vector.load %arg2[%c0_1, %c0_2, %c0_3] : memref<1x16x256xf32, #tpu.memory_space<vmem>>, vector<1x16x256xf32>
    %2 = vector.shape_cast %1 : vector<1x16x256xf32> to vector<16x256xf32>
    %cst = arith.constant dense<0.000000e+00> : vector<32x256xf32>
    %3 = tpu.matmul %0, %2, %cst {dimension_numbers = #tpu.dot_dimension_numbers<[1], [0], [0], [1], [0, 0, 1, 1], [], []>} : vector<32x16xf32>, vector<16x256xf32>, vector<32x256xf32> -> vector<32x256xf32>
    %c0_4 = arith.constant 0 : index
    %c0_5 = arith.constant 0 : index
    %4 = vector.load %arg4[%c0_4, %c0_5] : memref<32x1xf32, #tpu.memory_space<vmem>>, vector<32x1xf32>
    %5 = vector.broadcast %4 : vector<32x1xf32> to vector<32x256xf32>
    %6 = arith.addf %3, %5 : vector<32x256xf32>
    %c0_6 = arith.constant 0 : index
    %c0_7 = arith.constant 0 : index
    %c0_8 = arith.constant 0 : index
    %7 = vector.load %arg5[%c0_6, %c0_7, %c0_8] : memref<1x32x256xf32, #tpu.memory_space<vmem>>, vector<1x32x256xf32>
    %8 = vector.shape_cast %7 : vector<1x32x256xf32> to vector<32x256xf32>
    %9 = vector.shape_cast %6 : vector<32x256xf32> to vector<1x32x256xf32>
    tpu.vector_store %arg5[%c0_6, %c0_7, %c0_8], %9 {strides = array<i32>} : memref<1x32x256xf32, #tpu.memory_space<vmem>>, vector<1x32x256xf32>,
    return
  }
  func.func @transform_0(%arg0: i32, %arg1: i32) -> (i32, i32, i32) {
    %c0_i32 = arith.constant 0 : i32
    %c0_i32_0 = arith.constant 0 : i32
    return %arg0, %c0_i32, %arg1 : i32, i32, i32
  }
  func.func @transform_1(%arg0: i32, %arg1: i32) -> (i32, i32) {
    %c0_i32 = arith.constant 0 : i32
    %c0_i32_0 = arith.constant 0 : i32
    %c0_i32_1 = arith.constant 0 : i32
    return %c0_i32, %c0_i32_0 : i32, i32
  }
  func.func @transform_2(%arg0: i32, %arg1: i32) -> (i32, i32) {
    %c0_i32 = arith.constant 0 : i32
    %c0_i32_0 = arith.constant 0 : i32
    %c0_i32_1 = arith.constant 0 : i32
    return %c0_i32, %c0_i32_0 : i32, i32
  }
  func.func @transform_3(%arg0: i32, %arg1: i32) -> (i32, i32, i32) {
    %c0_i32 = arith.constant 0 : i32
    %c0_i32_0 = arith.constant 0 : i32
    return %arg0, %c0_i32, %arg1 : i32, i32, i32
  }
}

</mosaic_0001>

<bundles_post_ra>
// kernel: tile.8
= control target key start
LH: loop header
LB: loop body
LE: loop exit
PB: predicated region body
PF: predicated region fallthrough
CT: control target
= control target key end

     0   :  { %s22_s0 = inlined_call_operand.vmem [shape: f32[8], index: 0, kind: input, shape index: {}]   ;;  %s23_s1 = inlined_call_operand.vmem [shape: f32[4,8], index: 1, kind: output, shape index: {}]  }
   0x1   :  { %v4_v0 = vld [vmem:[%s22_s0] ss:$0 sm:$0xff] }
   0x2   :  { %5 = vst [vmem:[%s23_s1] sm:$0xf] %v4_v0 }

// kernel: tile.0
= control target key start
LH: loop header
LB: loop body
LE: loop exit
PB: predicated region body
PF: predicated region fallthrough
CT: control target
= control target key end

     0   :  { %s67_s8 = smov 125   ;;  %vm8_vm0 = vcmask 7168   ;;  %s68_s11 = smov 126   ;;  %s118_s0 = inlined_call_operand.vmem [shape: f32[4,8], index: 0, kind: input, shape index: {}]   ;;  %s119_s1 = inlined_call_operand.vmem [shape: f32[32,1], index: 1, kind: output, shape index: {}]  }
   0x1   :  { %v5_v0 = vld [vmem:[%s118_s0] sm:$0xf]  ;;  %s66_s0 = smov 127   ;;  %s69_s12 = smov 124  }
   0x2   :  { %6 = vst [vmem:[#allocation0] sm:$0xf] %v5_v0  ;;  %s70_s13 = smov 123   ;;  %s71_s14 = smov 122  }
   0x3   :  { %s72_s15 = smov 121  }
   0x9   :  { %v10_v1 = vld [vmem:[#allocation0] sm:$0xf]  }
   0xa   :  { %v22_v2 = vld [vmem:[#allocation0] sm:$0xf]   ;;  %11 = vrot.lane.b32.xlu0 %v10_v1, %s66_s0 }
   0xb   :  { %23 = vrot.lane.b32.xlu1 %v22_v2, %s67_s8  ;;  %v16_v3 = vld [vmem:[#allocation0] sm:$0xf]  }
   0xc   :  { %v28_v4 = vld [vmem:[#allocation0] sm:$0xf]  }
   0xd   :  { %v7_v5 = vld [vmem:[#allocation0] sm:$0xf]  }
   0xe   :  { %9 = vst.msk [vmem:[%s119_s1] ss:$8 sm:$0xf] %vm8_vm0, %v7_v5   ;;  %17 = vrot.lane.b32.xlu0 %v16_v3, %s68_s11  ;;  %v34_v6 = vld [vmem:[#allocation0] sm:$0xf]  }
   0xf   :  { %29 = vrot.lane.b32.xlu1 %v28_v4, %s69_s12  ;;  %v40_v7 = vld [vmem:[#allocation0] sm:$0xf]  }
  0x10   :  { %v46_v8 = vld [vmem:[#allocation0] sm:$0xf]  }
  0x12   :  { %35 = vrot.lane.b32.xlu0 %v34_v6, %s70_s13 }
  0x13   :  { %41 = vrot.lane.b32.xlu1 %v40_v7, %s71_s14 }
  0x16   :  { %47 = vrot.lane.b32.xlu0 %v46_v8, %s72_s15 }
  0x7c   :  { %v12_v9 = vpop.permute.xlu0 %11  }
  0x7d   :  { %v24_v10 = vpop.permute.xlu1 %23   ;;  %52 = vst.msk [vmem:[%s119_s1 + $0x1] ss:$8 sm:$0xf] %vm8_vm0, %v12_v9  }
  0x7e   :  { %54 = vst.msk [vmem:[%s119_s1 + $0x3] ss:$8 sm:$0xf] %vm8_vm0, %v24_v10  }
  0x80   :  { %v18_v11 = vpop.permute.xlu0 %17  }
  0x81   :  { %v30_v12 = vpop.permute.xlu1 %29   ;;  %53 = vst.msk [vmem:[%s119_s1 + $0x2] ss:$8 sm:$0xf] %vm8_vm0, %v18_v11  }
  0x82   :  { %55 = vst.msk [vmem:[%s119_s1 + $0x4] ss:$8 sm:$0xf] %vm8_vm0, %v30_v12  }
  0x84   :  { %v36_v13 = vpop.permute.xlu0 %35  }
  0x85   :  { %v42_v14 = vpop.permute.xlu1 %41   ;;  %56 = vst.msk [vmem:[%s119_s1 + $0x5] ss:$8 sm:$0xf] %vm8_vm0, %v36_v13  }
  0x86   :  { %57 = vst.msk [vmem:[%s119_s1 + $0x6] ss:$8 sm:$0xf] %vm8_vm0, %v42_v14  }
  0x88   :  { %v48_v15 = vpop.permute.xlu0 %47  }
  0x89   :  { %58 = vst.msk [vmem:[%s119_s1 + $0x7] ss:$8 sm:$0xf] %vm8_vm0, %v48_v15  }

// kernel: decoder_forward.1
= control target key start
LH: loop header
LB: loop body
LE: loop exit
PB: predicated region body
PF: predicated region fallthrough
CT: control target
= control target key end

     0   :  { %s534_s12 = smov 0   ;;  %s536_s13 = smov 0   ;;  %s599_s0 = inlined_call_operand.vmem [shape: f32[2,16,256], index: 0, kind: input, shape index: {}]   ;;  %s600_s1 = inlined_call_operand.vmem [shape: f32[32,16], index: 1, kind: input, shape index: {}]   ;;  %s601_s2 = inlined_call_operand.vmem [shape: f32[32,1], index: 2, kind: input, shape index: {}]   ;;  %s602_s3 = inlined_call_operand.vmem [shape: f32[2,32,256], index: 3, kind: output, shape index: {}]  }
   0x1   :  { %s538_s14 = smov 0  }
   0x2 LB: > { %s25_s15 = sadd.s32 1, %s506_s13  ;;  %p443_p0 = scmp.ge.s32.totalorder %s510_s14, 1  ;;  %s510_s14 = sphi %s538_s14, %s13_s14   ;;  %s506_s13 = sphi %s536_s13, %s604_s13   ;;  %s502_s12 = sphi %s534_s12, %s603_s12  }
   0x3   : > { %p27_p1 = scmp.ge.s32.totalorder %s25_s15, 2  ;;  %p158_p2 = scmp.lt.s32.totalorder %s510_s14, 3 }
   0x5   : > { %s606_s15 = smov (%p27_p1, %s25_s15), 0  ;;  %p159_p3 = pnand %p443_p0, %p158_p2 }
   0x6   : > { %p191_p4 = scmp.lt.s32.totalorder (!%p159_p3), %s502_s12, 1 }
   0x7   : > { %162 = sbr.rel (%p159_p3) target bundleno = 222 (0xde), region = 32 }
   0xc   : > { %v512_v0 = vmov 0.0   ;;  %v220_v1 = vld [vmem:[%s601_s2 + $0x10] sm:$0xff]  ;;  %v218_v2 = vld [vmem:[%s601_s2] sm:$0xff]  ;;  %s608_s12 = smov (!%p191_p4, %s502_s12), 1  ;;  %v513_v3 = vmov 0   ;;  %vm242_vm0 = vcmask 130048  }
   0xd   : > { %319 = vmatprep.mubr.f32.mxu0 %v512_v0  ;;  %331 = vmatprep.mubr.f32.mxu1 %v512_v0  ;;  %s454_s20 = sshll.u32 %s608_s12, 5  ;;  %v210_v8 = vld [vmem:[%s600_s1] sm:$0xff]  ;;  %v212_v9 = vld [vmem:[%s600_s1 + $0x10] sm:$0xff]  ;;  %v221_v10 = vld [vmem:[%s601_s2 + $0x18] sm:$0xff]  ;;  %s455_s9 = sshll.u32 %s608_s12, 6 }
   0xe   : > { %487 = vset.pattern.permute.xlu1 %v513_v3  ;;  %486 = vset.pattern.permute.xlu0 %v513_v3  ;;  %s198_s23 = scalar_lea.vmem %s599_s0, %s454_s20  ;;  %v219_v11 = vld [vmem:[%s601_s2 + $0x8] sm:$0xff]  ;;  %v213_v13 = vld [vmem:[%s600_s1 + $0x18] sm:$0xff]  ;;  %s208_s16 = scalar_lea.vmem %s602_s3, %s455_s9 }
   0xf   : > { %234 = vperm.xlu1 %487, %v220_v1   ;;  %224 = vperm.xlu0 %486, %v218_v2   ;;  %v217_v4 = vld [vmem:[%s198_s23 + $0x18] sm:$0xff]  ;;  %v216_v5 = vld [vmem:[%s198_s23 + $0x10] sm:$0xff]  ;;  %v215_v6 = vld [vmem:[%s198_s23 + $0x8] sm:$0xff] }
  0x10   : > { %283 = vmatprep.subr.mxu0 %v217_v4  ;;  %456 = vmatprep.subr.mxu1 %v217_v4  ;;  %v214_v7 = vld [vmem:[%s198_s23] sm:$0xff]  ;;  %v211_v12 = vld [vmem:[%s600_s1 + $0x8] sm:$0xff] }
  0x11   : > { %284 = vmatpush1.msra.mxu0 %v216_v5  ;;  %458 = vmatpush1.msra.mxu1 %v216_v5 }
  0x12   : > { %285 = vmatprep.subr.mxu0 %v215_v6  ;;  %457 = vmatprep.subr.mxu1 %v215_v6 }
  0x13   : > { %286 = vmatpush1.msra.mxu0 %v214_v7  ;;  %459 = vmatpush1.msra.mxu1 %v214_v7 }
  0x14   : > { %448 = vmatmul.mubr.msk.f32.vlgmr.msra.gmra.mxu0 %vm242_vm0, %v210_v8  ;;  %450 = vmatmul.mubr.msk.f32.vlgmr.msra.gmra.mxu1 %vm242_vm0, %v212_v9 }
  0x15   : > { %325 = vmatprep.mubr.f32.mxu0 %v512_v0  ;;  %337 = vmatprep.mubr.f32.mxu1 %v512_v0 }
  0x16   : > { %239 = vperm.xlu1 %487, %v221_v10   ;;  %229 = vperm.xlu0 %486, %v219_v11  }
  0x18   : > { %449 = vmatmul.mubr.msk.f32.gmra.mxu0 %vm242_vm0, %v211_v12  ;;  %451 = vmatmul.mubr.msk.f32.gmra.mxu1 %vm242_vm0, %v213_v13 }
  0x8a   : > { %v235_v14 = vpop.permute.xlu1 %234  ;;  %v225_v15 = vpop.permute.xlu0 %224 }
  0x91   : > { %v240_v22 = vpop.permute.xlu1 %239  ;;  %v230_v23 = vpop.permute.xlu0 %229 }
  0xd4   : > { %v321_v16 = vpop.f32.mrf.mxu0  ;;  %v333_v17 = vpop.f32.mrf.mxu1 }
  0xd5   : > { %v322_v18 = vadd.f32 %v321_v16, %v225_v15  ;;  %v334_v19 = vadd.f32 %v333_v17, %v235_v14 }
  0xd6   : > { %v323_v20 = vpop.f32.mrf.mxu0  ;;  %v335_v21 = vpop.f32.mrf.mxu1 }
  0xd7   : > { %344 = vst [vmem:[%s208_s16] sm:$0xff] %v322_v18  ;;  %348 = vst [vmem:[%s208_s16 + $0x20] sm:$0xff] %v334_v19  ;;  %v324_v24 = vadd.f32 %v323_v20, %v225_v15  ;;  %v336_v25 = vadd.f32 %v335_v21, %v235_v14 }
  0xd8   : > { %v327_v26 = vpop.f32.mrf.mxu0  ;;  %v339_v27 = vpop.f32.mrf.mxu1 }
  0xd9   : > { %345 = vst [vmem:[%s208_s16 + $0x8] sm:$0xff] %v324_v24  ;;  %349 = vst [vmem:[%s208_s16 + $0x28] sm:$0xff] %v336_v25  ;;  %v328_v28 = vadd.f32 %v327_v26, %v230_v23  ;;  %v340_v29 = vadd.f32 %v339_v27, %v240_v22 }
  0xda   : > { %v329_v30 = vpop.f32.mrf.mxu0  ;;  %v341_v31 = vpop.f32.mrf.mxu1 }
  0xdb   : > { %346 = vst [vmem:[%s208_s16 + $0x10] sm:$0xff] %v328_v28  ;;  %350 = vst [vmem:[%s208_s16 + $0x30] sm:$0xff] %v340_v29  ;;  %v330_v32 = vadd.f32 %v329_v30, %v230_v23  ;;  %v342_v33 = vadd.f32 %v341_v31, %v240_v22 }
  0xdd   : > { %347 = vst [vmem:[%s208_s16 + $0x18] sm:$0xff] %v330_v32  ;;  %351 = vst [vmem:[%s208_s16 + $0x38] sm:$0xff] %v342_v33 }
  0xde PF: > { %s13_s14 = sadd.s32 1, %s510_s14   ;;  %s603_s12 = smov %s506_s13 }
  0xdf   : > { %p10_p5 = scmp.ge.s32.totalorder %s13_s14, 4   ;;  %s604_s13 = smov %s606_s15 }
  0xe1   :  { %12 = sbr.rel (!%p10_p5) target bundleno = 2 (0x2), region = 62 }

</bundles_post_ra>
